<compile_context>
chip_gen: v7x
topology: tpu7x:2x2x1
jax: 0.10.0
libtpu: 0.0.40
codegen_flags: <defaults>
</compile_context>

<pallas_src>
import jax
import jax.numpy as jnp
from jax.experimental import pallas as pl
from jax.experimental.pallas import tpu as pltpu

_LANE = 128


def _round_up(n, m):
    return ((n + m - 1) // m) * m


def _sigmoid_1eup(z):
    # sigmoid(z) == 0.5 * tanh(0.5 * z) + 0.5  -> single EUP transcendental.
    return 0.5 * jnp.tanh(0.5 * z) + 0.5


def _siamese_kernel(xs_ref,
                    w1_ref, b1_ref, w2_ref, b2_ref, w3_ref, b3_ref,
                    w45_ref, b45_ref, w6_ref, b6_ref,
                    out_ref):
    """Fused SimpleSiamese forward for one batch tile of the stacked input."""
    _, tb, feat = xs_ref.shape
    # (2, TB, F) -> (2*TB, F): both shared-weight branches run as ONE matmul
    # chain.  TB is a multiple of 8, so this leading-dim merge is a no-op
    # relayout in VMEM.  xs is already bf16 (cast in the wrapper).
    xs = xs_ref[...].reshape(2 * tb, feat)

    def dot_bf16(a_bf16, w_ref):
        # bf16 operands on the MXU, f32 accumulation.
        return jnp.dot(a_bf16, w_ref[...], preferred_element_type=jnp.float32)

    # self.simple: Linear->ReLU x3, with simple[-1] folded into sig's Linear.
    h = jnp.maximum(dot_bf16(xs, w1_ref) + b1_ref[...], 0.0)                       # (2TB, 256)
    h = jnp.maximum(dot_bf16(h.astype(jnp.bfloat16), w2_ref) + b2_ref[...], 0.0)   # (2TB, 256)
    h = jnp.maximum(dot_bf16(h.astype(jnp.bfloat16), w3_ref) + b3_ref[...], 0.0)   # (2TB, 128)
    # folded Linear(128->64) @ Linear(64->16), padded to 128 lanes, + sigmoid
    z = dot_bf16(h.astype(jnp.bfloat16), w45_ref) + b45_ref[...]                    # (2TB, 128)
    s = _sigmoid_1eup(z)

    # Split the branches back along the leading axis and take the abs distance.
    s = s.reshape(2, tb, s.shape[-1])
    distance = jnp.abs(s[0] - s[1])                                                 # (TB, 128)

    # self.out: Linear(16,1) as VPU multiply + lane reduce (padded w6 lanes are
    # zero, so the padded 0.5-sigmoid lanes contribute nothing even before the
    # abs-diff cancellation).
    logits = jnp.sum(distance * w6_ref[...], axis=-1, keepdims=True) + b6_ref[...]  # (TB, 1)
    out_ref[...] = _sigmoid_1eup(logits)


def simple_siamese_forward(x1, x2, padded_params, *, tb=None,
                           vmem_limit_bytes=32 * 1024 * 1024):
    """padded_params: output of pad_and_cast_params (bf16 weights, f32 biases)."""
    assert x1.shape == x2.shape
    batch, feat = x1.shape

    if tb is None:
        # Large batches: 1024-row tiles (sweepable; safe for v7x's 64 MiB VMEM
        # and leaves >=4 even grid steps for megacore once batch >= 4096).
        # Tiny batches: a single tile rounded to 16 rows (bf16 sublane packing).
        tb = 1024 if batch > 1024 else _round_up(max(batch, 1), 16)
    tb = _round_up(tb, 16)
    b_pad = _round_up(batch, tb)

    # One stacked bf16 input: halves input HBM traffic and removes the
    # in-kernel concatenate.
    xs = jnp.stack([x1, x2], axis=0).astype(jnp.bfloat16)           # (2, B, F)
    if b_pad != batch:
        xs = jnp.pad(xs, ((0, 0), (0, b_pad - batch), (0, 0)))

    x_spec = pl.BlockSpec((2, tb, feat), lambda i: (0, i, 0))
    # Weights/biases: full-array blocks with a constant index_map so they stay
    # VMEM-resident across the batch grid (all params are 2-D).
    w_specs = [pl.BlockSpec(p.shape, lambda i: (0, 0)) for p in padded_params]

    out = pl.pallas_call(
        _siamese_kernel,
        out_shape=jax.ShapeDtypeStruct((b_pad, 1), jnp.float32),
        grid=(b_pad // tb,),
        in_specs=[x_spec] + w_specs,
        out_specs=pl.BlockSpec((tb, 1), lambda i: (i, 0)),
        compiler_params=pltpu.CompilerParams(
            dimension_semantics=("parallel",),       # shard batch tiles on v7x
            vmem_limit_bytes=vmem_limit_bytes),
    )(xs, *padded_params)
    return out[:batch]


def init_params(key, input_shape):
    """PyTorch-style uniform(-1/sqrt(fan_in), 1/sqrt(fan_in)) init, f32.

    Logical (unpadded) dims exactly match the nn.Module.  Weights stored
    (in, out); biases stored (1, out).
    """
    dims = [(input_shape, 196), (196, 196), (196, 128), (128, 64),  # self.simple
            (64, 16),                                               # self.sig
            (16, 1)]                                                # self.out
    params = []
    for (fan_in, fan_out) in dims:
        key, kw, kb = jax.random.split(key, 3)
        bound = 1.0 / jnp.sqrt(jnp.float32(fan_in))
        w = jax.random.uniform(kw, (fan_in, fan_out), jnp.float32, -bound, bound)
        b = jax.random.uniform(kb, (1, fan_out), jnp.float32, -bound, bound)
        params += [w, b]
    return tuple(params)


def pad_and_cast_params(params):
    """Fold simple[-1] with sig[0], zero-pad hidden dims to 128-multiples,
    cast weights to bf16 (biases stay f32).

    Zero-padding is exact: padded output columns have zero weight & bias, and
    the next layer's padded input rows are zero, so padded lanes never affect
    the real outputs (padded sigmoid lanes are 0.5 in both branches and cancel
    in the abs-diff; w6's padded lanes are zero).
    """
    (w1, b1, w2, b2, w3, b3, w4, b4, w5, b5, w6, b6) = params

    # Algebraic fold (no nonlinearity between simple[-1] and sig[0]).
    w45 = w4 @ w5                       # (128, 16)
    b45 = b4 @ w5 + b5                  # (1, 16)

    def pad2(a, rows, cols):
        return jnp.pad(a, ((0, rows - a.shape[0]), (0, cols - a.shape[1])))

    ws = [w1, w2, w3, w45]
    bs = [b1, b2, b3, b45]
    out_dims = [_round_up(w.shape[1], _LANE) for w in ws]   # [256, 256, 128, 128]

    padded = []
    in_dim = ws[0].shape[0]             # input feature dim stays unpadded
    for w, b, dout in zip(ws, bs, out_dims):
        padded.append(pad2(w, in_dim, dout).astype(jnp.bfloat16))
        padded.append(pad2(b, 1, dout))                      # f32
        in_dim = dout
    # Final Linear(16,1): padded (1, 128) f32 row for the in-kernel VPU/XLU
    # reduce (tiny, keep f32).
    padded.append(pad2(w6.T, 1, out_dims[-1]))
    padded.append(b6)                                        # (1, 1) f32
    return tuple(padded)


def reference_forward_f32(x1, x2, params):
    """Plain-JAX f32 reference mirroring the PyTorch module exactly."""
    w1, b1, w2, b2, w3, b3, w4, b4, w5, b5, w6, b6 = params

    def branch(x):
        h = jnp.maximum(x @ w1 + b1, 0.0)
        h = jnp.maximum(h @ w2 + b2, 0.0)
        h = jnp.maximum(h @ w3 + b3, 0.0)
        h = h @ w4 + b4
        return jax.nn.sigmoid(h @ w5 + b5)

    d = jnp.abs(branch(x1) - branch(x2))
    return jax.nn.sigmoid(d @ w6 + b6)


def reference_forward_mirrored(x1, x2, padded_params):
    """Plain-JAX mirror of the kernel math (bf16 inputs/weights, f32 acc,
    folded w45, tanh-based sigmoid)."""
    w1, b1, w2, b2, w3, b3, w45, b45, w6, b6 = padded_params

    def db(a, w):
        return jnp.dot(a.astype(jnp.bfloat16), w, preferred_element_type=jnp.float32)

    def branch(x):
        h = jnp.maximum(db(x, w1) + b1, 0.0)
        h = jnp.maximum(db(h, w2) + b2, 0.0)
        h = jnp.maximum(db(h, w3) + b3, 0.0)
        return _sigmoid_1eup(db(h, w45) + b45)

    d = jnp.abs(branch(x1.astype(jnp.bfloat16)) - branch(x2.astype(jnp.bfloat16)))
    return _sigmoid_1eup(jnp.sum(d * w6, axis=-1, keepdims=True) + b6)


if __name__ == "__main__":
    key = jax.random.PRNGKey(0)
    k_params, k_x1, k_x2 = jax.random.split(key, 3)

    batch = 8
    input_shape = 32

    logical_params = init_params(k_params, input_shape)
    padded_params = pad_and_cast_params(logical_params)

    x1 = jax.random.normal(k_x1, (batch, input_shape), jnp.float32)
    x2 = jax.random.normal(k_x2, (batch, input_shape), jnp.float32)

    out = simple_siamese_forward(x1, x2, padded_params)
    out = jax.block_until_ready(out)
    assert out.shape == (batch, 1)

    # Tight check against a plain-JAX mirror of the same (padded, bf16, folded)
    # math.
    ref_bf16 = reference_forward_mirrored(x1, x2, padded_params)
    assert jnp.allclose(out, ref_bf16, atol=2e-3, rtol=2e-3), \
        "Pallas output mismatch vs bf16 mirror reference"

    # Semantics check against the exact f32 module (bf16-rounding slack only).
    ref_f32 = reference_forward_f32(x1, x2, logical_params)
    assert jnp.allclose(out, ref_f32, atol=5e-2, rtol=5e-2), \
        "Pallas output mismatch vs f32 module reference"

    print("KERNEL_OK")
</pallas_src>

<mosaic_0001>
module attributes {stable_mosaic.version = 11 : i64} {
  func.func @_siamese_kernel(%arg0: i32, %arg1: memref<2x16x32xbf16, #tpu.memory_space<vmem>>, %arg2: memref<32x256xbf16, #tpu.memory_space<vmem>>, %arg3: memref<1x256xf32, #tpu.memory_space<vmem>>, %arg4: memref<256x256xbf16, #tpu.memory_space<vmem>>, %arg5: memref<1x256xf32, #tpu.memory_space<vmem>>, %arg6: memref<256x128xbf16, #tpu.memory_space<vmem>>, %arg7: memref<1x128xf32, #tpu.memory_space<vmem>>, %arg8: memref<128x128xbf16, #tpu.memory_space<vmem>>, %arg9: memref<1x128xf32, #tpu.memory_space<vmem>>, %arg10: memref<1x128xf32, #tpu.memory_space<vmem>>, %arg11: memref<1x1xf32, #tpu.memory_space<vmem>>, %arg12: memref<16x1xf32, #tpu.memory_space<vmem>>) attributes {dimension_semantics = [#tpu.dimension_semantics<parallel>], iteration_bounds = array<i64: 1>, scalar_prefetch = 0 : i64, scratch_operands = 0 : i64, tpu.core_type = #tpu.core_type<tc>, window_params = [{transform_indices = @transform_0, window_bounds = array<i64: 2, 16, 32>}, {pipeline_mode = #tpu.pipeline_mode<synchronous>, transform_indices = @transform_1, window_bounds = array<i64: 32, 256>}, {pipeline_mode = #tpu.pipeline_mode<synchronous>, transform_indices = @transform_2, window_bounds = array<i64: 1, 256>}, {pipeline_mode = #tpu.pipeline_mode<synchronous>, transform_indices = @transform_3, window_bounds = array<i64: 256, 256>}, {pipeline_mode = #tpu.pipeline_mode<synchronous>, transform_indices = @transform_4, window_bounds = array<i64: 1, 256>}, {pipeline_mode = #tpu.pipeline_mode<synchronous>, transform_indices = @transform_5, window_bounds = array<i64: 256, 128>}, {pipeline_mode = #tpu.pipeline_mode<synchronous>, transform_indices = @transform_6, window_bounds = array<i64: 1, 128>}, {pipeline_mode = #tpu.pipeline_mode<synchronous>, transform_indices = @transform_7, window_bounds = array<i64: 128, 128>}, {pipeline_mode = #tpu.pipeline_mode<synchronous>, transform_indices = @transform_8, window_bounds = array<i64: 1, 128>}, {pipeline_mode = #tpu.pipeline_mode<synchronous>, transform_indices = @transform_9, window_bounds = array<i64: 1, 128>}, {pipeline_mode = #tpu.pipeline_mode<synchronous>, transform_indices = @transform_10, window_bounds = array<i64: 1, 1>}, {transform_indices = @transform_11, window_bounds = array<i64: 16, 1>}]} {
    %c0 = arith.constant 0 : index
    %c0_0 = arith.constant 0 : index
    %c0_1 = arith.constant 0 : index
    %0 = vector.load %arg1[%c0, %c0_0, %c0_1] : memref<2x16x32xbf16, #tpu.memory_space<vmem>>, vector<2x16x32xbf16>
    %1 = vector.shape_cast %0 : vector<2x16x32xbf16> to vector<32x32xbf16>
    %c0_2 = arith.constant 0 : index
    %c0_3 = arith.constant 0 : index
    %2 = vector.load %arg2[%c0_2, %c0_3] : memref<32x256xbf16, #tpu.memory_space<vmem>>, vector<32x256xbf16>
    %cst = arith.constant dense<0.000000e+00> : vector<32x256xf32>
    %3 = tpu.matmul %1, %2, %cst {dimension_numbers = #tpu.dot_dimension_numbers<[1], [0], [0], [1], [0, 0, 1, 1], [], []>} : vector<32x32xbf16>, vector<32x256xbf16>, vector<32x256xf32> -> vector<32x256xf32>
    %c0_4 = arith.constant 0 : index
    %c0_5 = arith.constant 0 : index
    %4 = vector.load %arg3[%c0_4, %c0_5] : memref<1x256xf32, #tpu.memory_space<vmem>>, vector<1x256xf32>
    %5 = vector.broadcast %4 : vector<1x256xf32> to vector<32x256xf32>
    %6 = arith.addf %3, %5 : vector<32x256xf32>
    %cst_6 = arith.constant 0.000000e+00 : f32
    %7 = vector.broadcast %cst_6 : f32 to vector<32x256xf32>
    %8 = arith.maximumf %6, %7 : vector<32x256xf32>
    %9 = arith.truncf %8 : vector<32x256xf32> to vector<32x256xbf16>
    %c0_7 = arith.constant 0 : index
    %c0_8 = arith.constant 0 : index
    %10 = vector.load %arg4[%c0_7, %c0_8] : memref<256x256xbf16, #tpu.memory_space<vmem>>, vector<256x256xbf16>
    %cst_9 = arith.constant dense<0.000000e+00> : vector<32x256xf32>
    %11 = tpu.matmul %9, %10, %cst_9 {dimension_numbers = #tpu.dot_dimension_numbers<[1], [0], [0], [1], [0, 0, 1, 1], [], []>} : vector<32x256xbf16>, vector<256x256xbf16>, vector<32x256xf32> -> vector<32x256xf32>
    %c0_10 = arith.constant 0 : index
    %c0_11 = arith.constant 0 : index
    %12 = vector.load %arg5[%c0_10, %c0_11] : memref<1x256xf32, #tpu.memory_space<vmem>>, vector<1x256xf32>
    %13 = vector.broadcast %12 : vector<1x256xf32> to vector<32x256xf32>
    %14 = arith.addf %11, %13 : vector<32x256xf32>
    %cst_12 = arith.constant 0.000000e+00 : f32
    %15 = vector.broadcast %cst_12 : f32 to vector<32x256xf32>
    %16 = arith.maximumf %14, %15 : vector<32x256xf32>
    %17 = arith.truncf %16 : vector<32x256xf32> to vector<32x256xbf16>
    %c0_13 = arith.constant 0 : index
    %c0_14 = arith.constant 0 : index
    %18 = vector.load %arg6[%c0_13, %c0_14] : memref<256x128xbf16, #tpu.memory_space<vmem>>, vector<256x128xbf16>
    %cst_15 = arith.constant dense<0.000000e+00> : vector<32x128xf32>
    %19 = tpu.matmul %17, %18, %cst_15 {dimension_numbers = #tpu.dot_dimension_numbers<[1], [0], [0], [1], [0, 0, 1, 1], [], []>} : vector<32x256xbf16>, vector<256x128xbf16>, vector<32x128xf32> -> vector<32x128xf32>
    %c0_16 = arith.constant 0 : index
    %c0_17 = arith.constant 0 : index
    %20 = vector.load %arg7[%c0_16, %c0_17] : memref<1x128xf32, #tpu.memory_space<vmem>>, vector<1x128xf32>
    %21 = vector.broadcast %20 : vector<1x128xf32> to vector<32x128xf32>
    %22 = arith.addf %19, %21 : vector<32x128xf32>
    %cst_18 = arith.constant 0.000000e+00 : f32
    %23 = vector.broadcast %cst_18 : f32 to vector<32x128xf32>
    %24 = arith.maximumf %22, %23 : vector<32x128xf32>
    %25 = arith.truncf %24 : vector<32x128xf32> to vector<32x128xbf16>
    %c0_19 = arith.constant 0 : index
    %c0_20 = arith.constant 0 : index
    %26 = vector.load %arg8[%c0_19, %c0_20] : memref<128x128xbf16, #tpu.memory_space<vmem>>, vector<128x128xbf16>
    %cst_21 = arith.constant dense<0.000000e+00> : vector<32x128xf32>
    %27 = tpu.matmul %25, %26, %cst_21 {dimension_numbers = #tpu.dot_dimension_numbers<[1], [0], [0], [1], [0, 0, 1, 1], [], []>} : vector<32x128xbf16>, vector<128x128xbf16>, vector<32x128xf32> -> vector<32x128xf32>
    %c0_22 = arith.constant 0 : index
    %c0_23 = arith.constant 0 : index
    %28 = vector.load %arg9[%c0_22, %c0_23] : memref<1x128xf32, #tpu.memory_space<vmem>>, vector<1x128xf32>
    %29 = vector.broadcast %28 : vector<1x128xf32> to vector<32x128xf32>
    %30 = arith.addf %27, %29 : vector<32x128xf32>
    %cst_24 = arith.constant 5.000000e-01 : f32
    %31 = vector.broadcast %cst_24 : f32 to vector<32x128xf32>
    %32 = arith.mulf %31, %30 : vector<32x128xf32>
    %33 = math.tanh %32 : vector<32x128xf32>
    %cst_25 = arith.constant 5.000000e-01 : f32
    %34 = vector.broadcast %cst_25 : f32 to vector<32x128xf32>
    %35 = arith.mulf %34, %33 : vector<32x128xf32>
    %cst_26 = arith.constant 5.000000e-01 : f32
    %36 = vector.broadcast %cst_26 : f32 to vector<32x128xf32>
    %37 = arith.addf %35, %36 : vector<32x128xf32>
    %38 = vector.shape_cast %37 : vector<32x128xf32> to vector<2x16x128xf32>
    %39 = vector.extract_strided_slice %38 {offsets = [0, 0, 0], sizes = [1, 16, 128], strides = [1, 1, 1]} : vector<2x16x128xf32> to vector<1x16x128xf32>
    %40 = vector.shape_cast %39 : vector<1x16x128xf32> to vector<16x128xf32>
    %41 = vector.extract_strided_slice %38 {offsets = [1, 0, 0], sizes = [1, 16, 128], strides = [1, 1, 1]} : vector<2x16x128xf32> to vector<1x16x128xf32>
    %42 = vector.shape_cast %41 : vector<1x16x128xf32> to vector<16x128xf32>
    %43 = arith.subf %40, %42 : vector<16x128xf32>
    %44 = math.absf %43 : vector<16x128xf32>
    %c0_27 = arith.constant 0 : index
    %c0_28 = arith.constant 0 : index
    %45 = vector.load %arg10[%c0_27, %c0_28] : memref<1x128xf32, #tpu.memory_space<vmem>>, vector<1x128xf32>
    %46 = vector.broadcast %45 : vector<1x128xf32> to vector<16x128xf32>
    %47 = arith.mulf %44, %46 : vector<16x128xf32>
    %cst_29 = arith.constant dense<0.000000e+00> : vector<16xf32>
    %48 = vector.multi_reduction <add>, %47, %cst_29 [1] : vector<16x128xf32> to vector<16xf32>
    %49 = vector.shape_cast %48 : vector<16xf32> to vector<16x1xf32>
    %c0_30 = arith.constant 0 : index
    %c0_31 = arith.constant 0 : index
    %50 = vector.load %arg11[%c0_30, %c0_31] : memref<1x1xf32, #tpu.memory_space<vmem>>, vector<1x1xf32>
    %51 = vector.broadcast %50 : vector<1x1xf32> to vector<16x1xf32>
    %52 = arith.addf %49, %51 : vector<16x1xf32>
    %cst_32 = arith.constant 5.000000e-01 : f32
    %53 = vector.broadcast %cst_32 : f32 to vector<16x1xf32>
    %54 = arith.mulf %53, %52 : vector<16x1xf32>
    %55 = math.tanh %54 : vector<16x1xf32>
    %cst_33 = arith.constant 5.000000e-01 : f32
    %56 = vector.broadcast %cst_33 : f32 to vector<16x1xf32>
    %57 = arith.mulf %56, %55 : vector<16x1xf32>
    %cst_34 = arith.constant 5.000000e-01 : f32
    %58 = vector.broadcast %cst_34 : f32 to vector<16x1xf32>
    %59 = arith.addf %57, %58 : vector<16x1xf32>
    %c0_35 = arith.constant 0 : index
    %c0_36 = arith.constant 0 : index
    %60 = vector.load %arg12[%c0_35, %c0_36] : memref<16x1xf32, #tpu.memory_space<vmem>>, vector<16x1xf32>
    tpu.vector_store %arg12[%c0_35, %c0_36], %59 {strides = array<i32>} : memref<16x1xf32, #tpu.memory_space<vmem>>, vector<16x1xf32>,
    return
  }
  func.func @transform_0(%arg0: i32) -> (i32, i32, i32) {
    %c0_i32 = arith.constant 0 : i32
    %c0_i32_0 = arith.constant 0 : i32
    %c0_i32_1 = arith.constant 0 : i32
    return %c0_i32, %arg0, %c0_i32_0 : i32, i32, i32
  }
  func.func @transform_1(%arg0: i32) -> (i32, i32) {
    %c0_i32 = arith.constant 0 : i32
    %c0_i32_0 = arith.constant 0 : i32
    %c0_i32_1 = arith.constant 0 : i32
    return %c0_i32, %c0_i32_0 : i32, i32
  }
  func.func @transform_2(%arg0: i32) -> (i32, i32) {
    %c0_i32 = arith.constant 0 : i32
    %c0_i32_0 = arith.constant 0 : i32
    %c0_i32_1 = arith.constant 0 : i32
    return %c0_i32, %c0_i32_0 : i32, i32
  }
  func.func @transform_3(%arg0: i32) -> (i32, i32) {
    %c0_i32 = arith.constant 0 : i32
    %c0_i32_0 = arith.constant 0 : i32
    %c0_i32_1 = arith.constant 0 : i32
    return %c0_i32, %c0_i32_0 : i32, i32
  }
  func.func @transform_4(%arg0: i32) -> (i32, i32) {
    %c0_i32 = arith.constant 0 : i32
    %c0_i32_0 = arith.constant 0 : i32
    %c0_i32_1 = arith.constant 0 : i32
    return %c0_i32, %c0_i32_0 : i32, i32
  }
  func.func @transform_5(%arg0: i32) -> (i32, i32) {
    %c0_i32 = arith.constant 0 : i32
    %c0_i32_0 = arith.constant 0 : i32
    %c0_i32_1 = arith.constant 0 : i32
    return %c0_i32, %c0_i32_0 : i32, i32
  }
  func.func @transform_6(%arg0: i32) -> (i32, i32) {
    %c0_i32 = arith.constant 0 : i32
    %c0_i32_0 = arith.constant 0 : i32
    %c0_i32_1 = arith.constant 0 : i32
    return %c0_i32, %c0_i32_0 : i32, i32
  }
  func.func @transform_7(%arg0: i32) -> (i32, i32) {
    %c0_i32 = arith.constant 0 : i32
    %c0_i32_0 = arith.constant 0 : i32
    %c0_i32_1 = arith.constant 0 : i32
    return %c0_i32, %c0_i32_0 : i32, i32
  }
  func.func @transform_8(%arg0: i32) -> (i32, i32) {
    %c0_i32 = arith.constant 0 : i32
    %c0_i32_0 = arith.constant 0 : i32
    %c0_i32_1 = arith.constant 0 : i32
    return %c0_i32, %c0_i32_0 : i32, i32
  }
  func.func @transform_9(%arg0: i32) -> (i32, i32) {
    %c0_i32 = arith.constant 0 : i32
    %c0_i32_0 = arith.constant 0 : i32
    %c0_i32_1 = arith.constant 0 : i32
    return %c0_i32, %c0_i32_0 : i32, i32
  }
  func.func @transform_10(%arg0: i32) -> (i32, i32) {
    %c0_i32 = arith.constant 0 : i32
    %c0_i32_0 = arith.constant 0 : i32
    %c0_i32_1 = arith.constant 0 : i32
    return %c0_i32, %c0_i32_0 : i32, i32
  }
  func.func @transform_11(%arg0: i32) -> (i32, i32) {
    %c0_i32 = arith.constant 0 : i32
    %c0_i32_0 = arith.constant 0 : i32
    return %arg0, %c0_i32 : i32, i32
  }
}

</mosaic_0001>

<bundles_post_ra>
// kernel: tpu_custom_call.1
= control target key start
LH: loop header
LB: loop body
LE: loop exit
PB: predicated region body
PF: predicated region fallthrough
CT: control target
= control target key end

     0   :  { %s1385_s0 = inlined_call_operand.hbm [shape: bf16[2,16,32], index: 0, kind: input, shape index: {}]   ;;  %s1386_s1 = inlined_call_operand.hbm [shape: bf16[32,256], index: 1, kind: input, shape index: {}]   ;;  %s1387_s2 = inlined_call_operand.vmem [shape: f32[1,256], index: 2, kind: input, shape index: {}]   ;;  %s1388_s3 = inlined_call_operand.hbm [shape: bf16[256,256], index: 3, kind: input, shape index: {}]   ;;  %s1389_s4 = inlined_call_operand.vmem [shape: f32[1,256], index: 4, kind: input, shape index: {}]   ;;  %s1390_s5 = inlined_call_operand.hbm [shape: bf16[256,128], index: 5, kind: input, shape index: {}]   ;;  %s1391_s6 = inlined_call_operand.vmem [shape: f32[1,128], index: 6, kind: input, shape index: {}]   ;;  %s1392_s7 = inlined_call_operand.hbm [shape: bf16[128,128], index: 7, kind: input, shape index: {}]   ;;  %s1393_s8 = inlined_call_operand.vmem [shape: f32[1,128], index: 8, kind: input, shape index: {}]   ;;  %s1394_s9 = inlined_call_operand.vmem [shape: f32[1,128], index: 9, kind: input, shape index: {}]   ;;  %s1395_s10 = inlined_call_operand.<no memory space> [shape: f32[1,1], index: 10, kind: input, shape index: {}]   ;;  %s1396_s11 = inlined_call_operand.vmem [shape: f32[16,1], index: 11, kind: output, shape index: {}]  }
   0x1   :  { %v16_v0 = vstv %s1395_s10 }
   0x2   :  { %17 = vst [vmem:[#allocation2] sm:$0x1] %v16_v0 }
   0x3   :  { %18 = vsyncpa [#allocation4], 0 }
   0x4   :  { %19 = vsyncpa [#allocation6], 0 }
   0x5   :  { %20 = vsyncpa [#allocation9], 0  ;;  %s1214_s19 = smov [#allocation5]   ;;  %s1098_s23 = scalar_lea.hbm %s1386_s1, 512 }
   0x6   :  { %s38_s20 = sshll.u32 %s1214_s19, 4  ;;  %p1099_p0 = scmp.ne.s32.totalorder %s1386_s1, %s1098_s23  ;;  %s39_s20 = int_to_ptr.vmem [resolvable:$true] %s38_s20 }
   0x7   :  { %p1102_p1 = scmp.lt.u32.totalorder %s1098_s23, %s1386_s1 }
   0x9   :  { %p1104_p2 = pnand %p1102_p1, %p1099_p0 }
   0xb   :  { %1107 = shalt.err (!%p1104_p2)
}
   0xc   :  { %s1108_s10 = scalar_lea.vmem %s39_s20, 512  ;;  %p1113_p4 = scmp.lt.s32.totalorder %s39_s20, %s39_s20 }
   0xd   :  { %p1109_p3 = scmp.ne.s32.totalorder %s39_s20, %s1108_s10  ;;  %p1114_p5 = scmp.lt.s32.totalorder %s1108_s10, %s1108_s10 }
   0xf   :  { %p1115_p6 = por %p1114_p5, %p1113_p4 }
  0x11   :  { %p1116_p7 = pnand %p1115_p6, %p1109_p3 }
  0x13   :  { %1119 = shalt.err (!%p1116_p7)
}
  0x14   :  { %s1215_s28 = smov 128   ;;  %s1216_s29 = smov 8  }
  0x15   :  { %44 = dma.hbm_to_vmem [thread:$0]  %s1386_s1, 512, %s39_s20, [#allocation6], %s1215_s28, %s1215_s28, %s1216_s29  }
  0x16   :  { %s1217_s13 = smov [#allocation8]   ;;  %s1218_s15 = smov [#allocation3]  }
  0x17   :  { %s66_s14 = sshll.u32 %s1217_s13, 4  ;;  %s26_s16 = sshll.u32 %s1218_s15, 4  ;;  %s67_s14 = int_to_ptr.vmem [resolvable:$true] %s66_s14  ;;  %s27_s16 = int_to_ptr.vmem [resolvable:$true] %s26_s16 }
  0x18   :  { %s1120_s19 = scalar_lea.hbm %s1390_s5, 2048 }
  0x19   :  { %p1121_p8 = scmp.ne.s32.totalorder %s1390_s5, %s1120_s19  ;;  %p1124_p9 = scmp.lt.u32.totalorder %s1120_s19, %s1390_s5 }
  0x1b   :  { %p1126_p10 = pnand %p1124_p9, %p1121_p8 }
  0x1d   :  { %1129 = shalt.err (!%p1126_p10)
}
  0x1e   :  { %s1130_s1 = scalar_lea.vmem %s67_s14, 2048  ;;  %p1135_p12 = scmp.lt.s32.totalorder %s67_s14, %s67_s14 }
  0x1f   :  { %p1131_p11 = scmp.ne.s32.totalorder %s67_s14, %s1130_s1  ;;  %p1136_p13 = scmp.lt.s32.totalorder %s1130_s1, %s1130_s1 }
  0x21   :  { %p1137_p0 = por %p1136_p13, %p1135_p12 }
  0x23   :  { %p1138_p1 = pnand %p1137_p0, %p1131_p11 }
  0x25   :  { %1141 = shalt.err (!%p1138_p1)
}
  0x26   :  { %s1219_s20 = smov 64   ;;  %s1220_s25 = smov 4  }
  0x27   :  { %72 = dma.hbm_to_vmem [thread:$0]  %s1390_s5, 2048, %s67_s14, [#allocation9], %s1219_s20, %s1219_s20, %s1220_s25  }
  0x28   :  { %s1142_s12 = scalar_lea.hbm %s1385_s0, 256 }
  0x29   :  { %p1143_p2 = scmp.ne.s32.totalorder %s1385_s0, %s1142_s12  ;;  %p1146_p3 = scmp.lt.u32.totalorder %s1142_s12, %s1385_s0 }
  0x2b   :  { %p1148_p4 = pnand %p1146_p3, %p1143_p2 }
  0x2d   :  { %1151 = shalt.err (!%p1148_p4)
}
  0x2e   :  { %s1152_s19 = scalar_lea.vmem %s27_s16, 256  ;;  %p1157_p6 = scmp.lt.s32.totalorder %s27_s16, %s27_s16 }
  0x2f   :  { %p1153_p5 = scmp.ne.s32.totalorder %s27_s16, %s1152_s19  ;;  %p1158_p7 = scmp.lt.s32.totalorder %s1152_s19, %s1152_s19 }
  0x31   :  { %p1159_p8 = por %p1158_p7, %p1157_p6 }
  0x33   :  { %p1160_p9 = pnand %p1159_p8, %p1153_p5 }
  0x35   :  { %1163 = shalt.err (!%p1160_p9)
}
  0x36   :  { %32 = dma.hbm_to_vmem [thread:$0]  %s1385_s0, 256, %s27_s16, [#allocation4], %s1219_s20, %s1219_s20, %s1220_s25  }
  0x37   :  { %s1221_s21 = smov [#allocation7]   ;;  %s1222_s23 = smov [#allocation10]  }
  0x38   :  { %s52_s22 = sshll.u32 %s1221_s21, 4  ;;  %s80_s24 = sshll.u32 %s1222_s23, 4  ;;  %s53_s22 = int_to_ptr.vmem [resolvable:$true] %s52_s22  ;;  %s81_s24 = int_to_ptr.vmem [resolvable:$true] %s80_s24 }
  0x39   :  { %s1164_s27 = scalar_lea.hbm %s1388_s3, 4096 }
  0x3a   :  { %p1165_p10 = scmp.ne.s32.totalorder %s1388_s3, %s1164_s27  ;;  %p1168_p11 = scmp.lt.u32.totalorder %s1164_s27, %s1388_s3 }
  0x3c   :  { %p1170_p12 = pnand %p1168_p11, %p1165_p10 }
  0x3e   :  { %1173 = shalt.err (!%p1170_p12)
}
  0x3f   :  { %s1174_s0 = scalar_lea.vmem %s53_s22, 4096  ;;  %p1179_p0 = scmp.lt.s32.totalorder %s53_s22, %s53_s22 }
  0x40   :  { %p1175_p13 = scmp.ne.s32.totalorder %s53_s22, %s1174_s0  ;;  %p1180_p1 = scmp.lt.s32.totalorder %s1174_s0, %s1174_s0 }
  0x42   :  { %p1181_p2 = por %p1180_p1, %p1179_p0 }
  0x44   :  { %p1182_p3 = pnand %p1181_p2, %p1175_p13 }
  0x46   :  { %1185 = shalt.err (!%p1182_p3)
}
  0x47   :  { %58 = dma.hbm_to_vmem [thread:$0]  %s1388_s3, 4096, %s53_s22, [#allocation6], %s1215_s28, %s1215_s28, %s1216_s29  }
  0x48   :  { %s1186_s19 = scalar_lea.hbm %s1392_s7, 1024 }
  0x49   :  { %p1187_p4 = scmp.ne.s32.totalorder %s1392_s7, %s1186_s19  ;;  %p1190_p5 = scmp.lt.u32.totalorder %s1186_s19, %s1392_s7 }
  0x4b   :  { %p1192_p6 = pnand %p1190_p5, %p1187_p4 }
  0x4d   :  { %1195 = shalt.err (!%p1192_p6)
}
  0x4e   :  { %s1196_s1 = scalar_lea.vmem %s81_s24, 1024  ;;  %p1201_p8 = scmp.lt.s32.totalorder %s81_s24, %s81_s24 }
  0x4f   :  { %p1197_p7 = scmp.ne.s32.totalorder %s81_s24, %s1196_s1  ;;  %p1202_p9 = scmp.lt.s32.totalorder %s1196_s1, %s1196_s1 }
  0x51   :  { %p1203_p10 = por %p1202_p9, %p1201_p8 }
  0x53   :  { %p1204_p11 = pnand %p1203_p10, %p1197_p7 }
  0x55   :  { %1207 = shalt.err (!%p1204_p11)
}
  0x56   :  { %86 = dma.hbm_to_vmem [thread:$0]  %s1392_s7, 1024, %s81_s24, [#allocation9], %s1219_s20, %s1219_s20, %s1220_s25  }
  0x57   :  { %1208 = dma.done.wait [#allocation4], 256  }
  0x58   :  { %1209 = vsyncadd [#allocation4], 4294967040 }
  0x59   :  { %1210 = dma.done.wait [#allocation6], 4608  }
  0x5a   :  { %1211 = vsyncadd [#allocation6], 4294962688 }
  0x5b   :  { %1212 = dma.done.wait [#allocation9], 3072  }
  0x5c   :  { %1213 = vsyncadd [#allocation9], 4294964224  ;;  %v1223_v1 = vmov 0   ;;  %v1006_v2 = vld [vmem:[#allocation5 + $0x4] ss:$8 sps:$4 sm:$0xff]   ;;  %v1012_v6 = vld [vmem:[#allocation3] sm:$0xff]   ;;  %v119_v51 = vlaneseq }
  0x5d   :  { %198 = vmatprep.mubr.bf16.mxu0 %v1223_v1  ;;  %v1008_v3 = vld [vmem:[#allocation5] ss:$8 sps:$4 sm:$0xff]   ;;  %166 = vmatprep.subr.bf16.mxu0 %v1006_v2  ;;  %v1009_v4 = vld [vmem:[#allocation5 + $0x14] ss:$8 sps:$4 sm:$0xff]   ;;  %v1011_v5 = vld [vmem:[#allocation5 + $0x10] ss:$8 sps:$4 sm:$0xff]  }
  0x5e   :  { %167 = vmatpush1.bf16.msra.mxu0 %v1008_v3  ;;  %v1014_v7 = vld [vmem:[#allocation7 + $0x4] ss:$8 sps:$4 sm:$0xff]   ;;  %v1016_v8 = vld [vmem:[#allocation7] ss:$8 sps:$4 sm:$0xff]   ;;  %v1017_v9 = vld [vmem:[#allocation7 + $0x14] ss:$8 sps:$4 sm:$0xff]  }
  0x5f   :  { %168 = vmatprep.subr.bf16.mxu0 %v1009_v4  ;;  %vm159_vm0 = vcmask 261120   ;;  %435 = vmatprep.subr.bf16.mxu1 %v1014_v7  ;;  %v1019_v10 = vld [vmem:[#allocation7 + $0x10] ss:$8 sps:$4 sm:$0xff]   ;;  %v1020_v11 = vld [vmem:[#allocation7 + $0x24] ss:$8 sps:$4 sm:$0xff]   ;;  %v120_v52 = vshrl.u32 %v119_v51, 7 }
  0x60   :  { %436 = vmatpush1.bf16.msra.mxu1 %v1016_v8  ;;  %v1022_v12 = vld [vmem:[#allocation7 + $0x20] ss:$8 sps:$4 sm:$0xff]   ;;  %v1023_v13 = vld [vmem:[#allocation7 + $0x34] ss:$8 sps:$4 sm:$0xff]   ;;  %v1025_v15 = vld [vmem:[#allocation7 + $0x30] ss:$8 sps:$4 sm:$0xff]  }
  0x61   :  { %437 = vmatprep.subr.bf16.mxu1 %v1017_v9  ;;  %v1013_v14 = vld [vmem:[#allocation3 + $0x8] sm:$0xff]   ;;  %v1026_v16 = vld [vmem:[#allocation7 + $0x44] ss:$8 sps:$4 sm:$0xff]   ;;  %v1028_v17 = vld [vmem:[#allocation7 + $0x40] ss:$8 sps:$4 sm:$0xff]   ;;  %v121_v53 = vsub.s32 0, %v120_v52 }
  0x62   :  { %169 = vmatpush1.bf16.msra.mxu0 %v1011_v5  ;;  %v1029_v18 = vld [vmem:[#allocation7 + $0x54] ss:$8 sps:$4 sm:$0xff]   ;;  %v1031_v19 = vld [vmem:[#allocation7 + $0x50] ss:$8 sps:$4 sm:$0xff]   ;;  %v1032_v20 = vld [vmem:[#allocation7 + $0x64] ss:$8 sps:$4 sm:$0xff]  }
  0x63   :  { %v1034_v21 = vld [vmem:[#allocation7 + $0x60] ss:$8 sps:$4 sm:$0xff]   ;;  %v1035_v22 = vld [vmem:[#allocation7 + $0x74] ss:$8 sps:$4 sm:$0xff]   ;;  %v1037_v23 = vld [vmem:[#allocation7 + $0x70] ss:$8 sps:$4 sm:$0xff]  }
  0x64   :  { %438 = vmatpush1.bf16.msra.mxu1 %v1019_v10  ;;  %v1038_v24 = vld [vmem:[#allocation7 + $0x84] ss:$8 sps:$4 sm:$0xff]   ;;  %v1040_v25 = vld [vmem:[#allocation7 + $0x80] ss:$8 sps:$4 sm:$0xff]   ;;  %v1041_v26 = vld [vmem:[#allocation7 + $0x94] ss:$8 sps:$4 sm:$0xff]  }
  0x65   :  { %876 = vmatmul.mubr.msk.bf16.vlgmr.msra.gmra.mrb[0].mxu0 %vm159_vm0, %v1012_v6  ;;  %439 = vmatprep.subr.bf16.mxu1 %v1020_v11  ;;  %v1043_v27 = vld [vmem:[#allocation7 + $0x90] ss:$8 sps:$4 sm:$0xff]   ;;  %v1044_v28 = vld [vmem:[#allocation7 + $0xa4] ss:$8 sps:$4 sm:$0xff]   ;;  %v1046_v29 = vld [vmem:[#allocation7 + $0xa0] ss:$8 sps:$4 sm:$0xff]  }
  0x66   :  { %208 = vmatprep.mubr.bf16.mxu0 %v1223_v1  ;;  %v1047_v30 = vld [vmem:[#allocation7 + $0xb4] ss:$8 sps:$4 sm:$0xff]   ;;  %v1049_v31 = vld [vmem:[#allocation7 + $0xb0] ss:$8 sps:$4 sm:$0xff]   ;;  %v1050_v32 = vld [vmem:[#allocation7 + $0xc4] ss:$8 sps:$4 sm:$0xff]  }
  0x67   :  { %v1052_v33 = vld [vmem:[#allocation7 + $0xc0] ss:$8 sps:$4 sm:$0xff]   ;;  %v1053_v34 = vld [vmem:[#allocation7 + $0xd4] ss:$8 sps:$4 sm:$0xff]   ;;  %v1055_v35 = vld [vmem:[#allocation7 + $0xd0] ss:$8 sps:$4 sm:$0xff]  }
  0x68   :  { %440 = vmatpush1.bf16.msra.mxu1 %v1022_v12  ;;  %v1056_v36 = vld [vmem:[#allocation7 + $0xe4] ss:$8 sps:$4 sm:$0xff]   ;;  %v1058_v37 = vld [vmem:[#allocation7 + $0xe0] ss:$8 sps:$4 sm:$0xff]   ;;  %v1059_v38 = vld [vmem:[#allocation7 + $0xf4] ss:$8 sps:$4 sm:$0xff]  }
  0x69   :  { %441 = vmatprep.subr.bf16.mxu1 %v1023_v13  ;;  %v1061_v39 = vld [vmem:[#allocation7 + $0xf0] ss:$8 sps:$4 sm:$0xff]   ;;  %v1062_v40 = vld [vmem:[#allocation8 + $0x40] sm:$0xff]   ;;  %v1064_v42 = vld [vmem:[#allocation8 + $0x48] sm:$0xff]   ;;  %v125_v55 = vsub.s32 1, %v120_v52  ;;  %vm860_vm1 = vcmask 7168  }
  0x6a   :  { %v1063_v41 = vld [vmem:[#allocation8] sm:$0xff]   ;;  %938 = vmatprep.subr.bf16.mxu0 %v1062_v40  ;;  %v1065_v43 = vld [vmem:[#allocation8 + $0x8] sm:$0xff]   ;;  %v1066_v44 = vld [vmem:[#allocation8 + $0x50] sm:$0xff]  }
  0x6b   :  { %939 = vmatpush3.bf16.msra.mxu0 %v1063_v41  ;;  %v1067_v45 = vld [vmem:[#allocation8 + $0x10] sm:$0xff]   ;;  %v1068_v46 = vld [vmem:[#allocation8 + $0x58] sm:$0xff]   ;;  %v1070_v48 = vld [vmem:[#allocation8 + $0x60] sm:$0xff]  }
  0x6c   :  { %442 = vmatpush1.bf16.msra.mxu1 %v1025_v15  ;;  %940 = vmatprep.subr.bf16.mxu0 %v1064_v42  ;;  %v1069_v47 = vld [vmem:[#allocation8 + $0x18] sm:$0xff]   ;;  %v1071_v49 = vld [vmem:[#allocation8 + $0x20] sm:$0xff]   ;;  %v1072_v50 = vld [vmem:[#allocation8 + $0x68] sm:$0xff]  }
  0x6d   :  { %877 = vmatmul.mubr.msk.bf16.gmra.mrb[4].mxu0 %vm159_vm0, %v1013_v14  ;;  %443 = vmatprep.subr.bf16.mxu1 %v1026_v16  ;;  %v117_v54 = vld [vmem:[%s1387_s2] sm:$0x3] }
  0x6e   :  { %v122_v56 = vrot.slane %v117_v54, %v121_v53  ;;  %v126_v57 = vrot.slane %v117_v54, %v125_v55 }
  0x6f   :  { %941 = vmatpush3.bf16.msra.mxu0 %v1065_v43 }
  0x70   :  { %444 = vmatpush1.bf16.msra.mxu1 %v1028_v17  ;;  %942 = vmatprep.subr.bf16.mxu0 %v1066_v44 }
  0x71   :  { %445 = vmatprep.subr.bf16.mxu1 %v1029_v18 }
  0x73   :  { %943 = vmatpush3.bf16.msra.mxu0 %v1067_v45 }
  0x74   :  { %446 = vmatpush1.bf16.msra.mxu1 %v1031_v19  ;;  %944 = vmatprep.subr.bf16.mxu0 %v1068_v46 }
  0x75   :  { %447 = vmatprep.subr.bf16.mxu1 %v1032_v20 }
  0x77   :  { %945 = vmatpush3.bf16.msra.mxu0 %v1069_v47 }
  0x78   :  { %448 = vmatpush1.bf16.msra.mxu1 %v1034_v21  ;;  %946 = vmatprep.subr.bf16.mxu0 %v1070_v48  ;;  %v1079_v48 = vld [vmem:[#allocation10 + $0x8] sm:$0xff]  }
  0x79   :  { %449 = vmatprep.subr.bf16.mxu1 %v1035_v22  ;;  %v1073_v22 = vld [vmem:[#allocation8 + $0x28] sm:$0xff]  }
  0x7b   :  { %947 = vmatpush3.bf16.msra.mxu0 %v1071_v49 }
  0x7c   :  { %450 = vmatpush1.bf16.msra.mxu1 %v1037_v23  ;;  %948 = vmatprep.subr.bf16.mxu0 %v1072_v50  ;;  %v1074_v23 = vld [vmem:[#allocation8 + $0x70] sm:$0xff]  }
  0x7d   :  { %451 = vmatprep.subr.bf16.mxu1 %v1038_v24  ;;  %v1075_v24 = vld [vmem:[#allocation8 + $0x30] sm:$0xff]  }
  0x7f   :  { %949 = vmatpush3.bf16.msra.mxu0 %v1073_v22 }
  0x80   :  { %452 = vmatpush1.bf16.msra.mxu1 %v1040_v25  ;;  %950 = vmatprep.subr.bf16.mxu0 %v1074_v23  ;;  %v1076_v25 = vld [vmem:[#allocation8 + $0x78] sm:$0xff]  }
  0x81   :  { %453 = vmatprep.subr.bf16.mxu1 %v1041_v26  ;;  %v1077_v26 = vld [vmem:[#allocation8 + $0x38] sm:$0xff]  }
  0x83   :  { %951 = vmatpush3.bf16.msra.mxu0 %v1075_v24 }
  0x84   :  { %454 = vmatpush1.bf16.msra.mxu1 %v1043_v27  ;;  %952 = vmatprep.subr.bf16.mxu0 %v1076_v25  ;;  %v1078_v27 = vld [vmem:[#allocation10] sm:$0xff]   ;;  %v927_v25 = vld [vmem:[%s1393_s8] ss:$0 sm:$0xff] }
  0x85   :  { %455 = vmatprep.subr.bf16.mxu1 %v1044_v28  ;;  %v263_v28 = vld [vmem:[%s1389_s4] sm:$0x3] }
  0x87   :  { %953 = vmatpush3.bf16.msra.mxu0 %v1077_v26 }
  0x88   :  { %456 = vmatpush1.bf16.msra.mxu1 %v1046_v29  ;;  %976 = vmatprep.subr.bf16.mxu0 %v1078_v27  ;;  %v268_v29 = vrot.slane %v263_v28, %v121_v53 }
  0x89   :  { %457 = vmatprep.subr.bf16.mxu1 %v1047_v30  ;;  %v272_v30 = vrot.slane %v263_v28, %v125_v55 }
  0x8c   :  { %458 = vmatpush1.bf16.msra.mxu1 %v1049_v31 }
  0x8d   :  { %459 = vmatprep.subr.bf16.mxu1 %v1050_v32 }
  0x90   :  { %460 = vmatpush1.bf16.msra.mxu1 %v1052_v33 }
  0x91   :  { %461 = vmatprep.subr.bf16.mxu1 %v1053_v34 }
  0x94   :  { %462 = vmatpush1.bf16.msra.mxu1 %v1055_v35 }
  0x95   :  { %463 = vmatprep.subr.bf16.mxu1 %v1056_v36 }
  0x98   :  { %464 = vmatpush1.bf16.msra.mxu1 %v1058_v37 }
  0x99   :  { %465 = vmatprep.subr.bf16.mxu1 %v1059_v38 }
  0x9c   :  { %466 = vmatpush1.bf16.msra.mxu1 %v1061_v39 }
 0x138   :  { %v200_v58 = vpop.f32.mrb[0].mxu0 }
 0x139   :  { %v201_v59 = vadd.f32 %v200_v58, %v122_v56  ;;  %v202_v60 = vpop.f32.mrb[1].mxu0 }
 0x13a   :  { %v203_v61 = vadd.f32 %v202_v60, %v126_v57  ;;  %v204_v62 = vpop.f32.mrb[2].mxu0 }
 0x13b   :  { %v205_v63 = vadd.f32 %v204_v62, %v122_v56  ;;  %v206_v0 = vpop.f32.mrb[3].mxu0  ;;  %v219_v2 = vmax.f32 %v201_v59, 0.0  ;;  %v1082_v62 = vld [vmem:[#allocation10 + $0x20] sm:$0xff]  }
 0x13c   :  { %v207_v1 = vadd.f32 %v206_v0, %v126_v57  ;;  %v220_v4 = vmax.f32 %v203_v61, 0.0  ;;  %v1081_v61 = vld [vmem:[#allocation10 + $0x18] sm:$0xff]   ;;  %v1084_v0 = vld [vmem:[#allocation10 + $0x30] sm:$0xff]  }
 0x13d   :  { %v221_v3 = vmax.f32 %v205_v63, 0.0  ;;  %v1083_v63 = vld [vmem:[#allocation10 + $0x28] sm:$0xff]  }
 0x13e   :  { %v222_v5 = vmax.f32 %v207_v1, 0.0  ;;  %v1085_v1 = vld [vmem:[#allocation10 + $0x38] sm:$0xff]  }
 0x13f   :  { %v227_v6 = vpack.c.bf16 %v221_v3, %v219_v2  ;;  %v910_v3 = vld [vmem:[%s1391_s6] ss:$0 sm:$0xff] }
 0x140   :  { %v210_v7 = vpop.f32.mrb[4].mxu0  ;;  %v228_v8 = vpack.c.bf16 %v222_v5, %v220_v4 }
 0x141   :  { %v211_v9 = vadd.f32 %v210_v7, %v122_v56  ;;  %v212_v10 = vpop.f32.mrb[5].mxu0 }
 0x142   :  { %v213_v11 = vadd.f32 %v212_v10, %v126_v57  ;;  %v214_v12 = vpop.f32.mrb[6].mxu0  ;;  %467 = vmatprep.mubr.bf16.mxu1 %v228_v8 }
 0x143   :  { %v215_v13 = vadd.f32 %v214_v12, %v122_v56  ;;  %v216_v14 = vpop.f32.mrb[7].mxu0  ;;  %468 = vmatmul.mubr.bf16.vlgmr.msra.gmra.mrb[0].mxu1 %v227_v6  ;;  %v223_v16 = vmax.f32 %v211_v9, 0.0  ;;  %v1080_v56 = vld [vmem:[#allocation10 + $0x10] sm:$0xff]  }
 0x144   :  { %v217_v15 = vadd.f32 %v216_v14, %v126_v57  ;;  %v224_v18 = vmax.f32 %v213_v11, 0.0 }
 0x145   :  { %v225_v17 = vmax.f32 %v215_v13, 0.0 }
 0x146   :  { %v226_v19 = vmax.f32 %v217_v15, 0.0 }
 0x147   :  { %v229_v20 = vpack.c.bf16 %v225_v17, %v223_v16 }
 0x148   :  { %v230_v21 = vpack.c.bf16 %v226_v19, %v224_v18 }
 0x14a   :  { %477 = vmatprep.mubr.bf16.mxu1 %v230_v21 }
 0x14b   :  { %478 = vmatmul.mubr.bf16.gmra.mrb[4].mxu1 %v229_v20 }
 0x216   :  { %v469_v31 = vpop.f32.mrb[0].mxu1 }
 0x217   :  { %v470_v32 = vadd.f32 %v469_v31, %v268_v29  ;;  %v471_v33 = vpop.f32.mrb[1].mxu1 }
 0x218   :  { %v472_v34 = vadd.f32 %v471_v33, %v272_v30  ;;  %v473_v35 = vpop.f32.mrb[2].mxu1 }
 0x219   :  { %v474_v36 = vadd.f32 %v473_v35, %v268_v29  ;;  %v475_v37 = vpop.f32.mrb[3].mxu1  ;;  %v488_v39 = vmax.f32 %v470_v32, 0.0 }
 0x21a   :  { %v476_v38 = vadd.f32 %v475_v37, %v272_v30  ;;  %v489_v41 = vmax.f32 %v472_v34, 0.0 }
 0x21b   :  { %v490_v40 = vmax.f32 %v474_v36, 0.0 }
 0x21c   :  { %v491_v42 = vmax.f32 %v476_v38, 0.0 }
 0x21d   :  { %v496_v43 = vpack.c.bf16 %v490_v40, %v488_v39 }
 0x21e   :  { %v497_v44 = vpack.c.bf16 %v491_v42, %v489_v41  ;;  %v479_v45 = vpop.f32.mrb[4].mxu1 }
 0x21f   :  { %v480_v46 = vadd.f32 %v479_v45, %v268_v29  ;;  %v481_v47 = vpop.f32.mrb[5].mxu1 }
 0x220   :  { %v482_v49 = vadd.f32 %v481_v47, %v272_v30  ;;  %v483_v50 = vpop.f32.mrb[6].mxu1  ;;  %667 = vmatprep.mubr.bf16.mxu0 %v497_v44 }
 0x221   :  { %v484_v51 = vadd.f32 %v483_v50, %v268_v29  ;;  %v485_v52 = vpop.f32.mrb[7].mxu1  ;;  %668 = vmatmul.mubr.bf16.vlgmr.msra.gmra.mrb[8].mxu0 %v496_v43  ;;  %v492_v54 = vmax.f32 %v480_v46, 0.0 }
 0x222   :  { %v486_v53 = vadd.f32 %v485_v52, %v272_v30  ;;  %977 = vmatpush3.bf16.msra.mxu0 %v1078_v27  ;;  %v493_v57 = vmax.f32 %v482_v49, 0.0 }
 0x223   :  { %v494_v55 = vmax.f32 %v484_v51, 0.0  ;;  %978 = vmatprep.subr.bf16.mxu0 %v1079_v48  ;;  %v936_v51 = vld [vmem:[%s1394_s9] ss:$0 sm:$0xff] }
 0x224   :  { %v495_v58 = vmax.f32 %v486_v53, 0.0 }
 0x225   :  { %v498_v59 = vpack.c.bf16 %v494_v55, %v492_v54 }
 0x226   :  { %v499_v60 = vpack.c.bf16 %v495_v58, %v493_v57  ;;  %979 = vmatpush3.bf16.msra.mxu0 %v1079_v48  ;;  %v937_v57 = vld [vmem:[#allocation2] ss:$0 sm:$0xff] }
 0x227   :  { %980 = vmatprep.subr.bf16.mxu0 %v1080_v56 }
 0x228   :  { %675 = vmatprep.mubr.bf16.mxu0 %v499_v60 }
 0x229   :  { %676 = vmatmul.mubr.bf16.gmra.mrb[12].mxu0 %v498_v59 }
 0x22a   :  { %981 = vmatpush3.bf16.msra.mxu0 %v1080_v56 }
 0x22b   :  { %982 = vmatprep.subr.bf16.mxu0 %v1081_v61 }
 0x22e   :  { %983 = vmatpush3.bf16.msra.mxu0 %v1081_v61 }
 0x22f   :  { %984 = vmatprep.subr.bf16.mxu0 %v1082_v62 }
 0x232   :  { %985 = vmatpush3.bf16.msra.mxu0 %v1082_v62 }
 0x233   :  { %986 = vmatprep.subr.bf16.mxu0 %v1083_v63 }
 0x236   :  { %987 = vmatpush3.bf16.msra.mxu0 %v1083_v63 }
 0x237   :  { %988 = vmatprep.subr.bf16.mxu0 %v1084_v0 }
 0x23a   :  { %989 = vmatpush3.bf16.msra.mxu0 %v1084_v0 }
 0x23b   :  { %990 = vmatprep.subr.bf16.mxu0 %v1085_v1 }
 0x23e   :  { %991 = vmatpush3.bf16.msra.mxu0 %v1085_v1 }
 0x2f4   :  { %v954_v2 = vpop.f32.mrb[8].mxu0 }
 0x2f5   :  { %v955_v4 = vpop.f32.mrb[9].mxu0 }
 0x2f6   :  { %v956_v5 = vadd.f32 %v955_v4, %v954_v2  ;;  %v957_v6 = vpop.f32.mrb[10].mxu0 }
 0x2f7   :  { %v958_v7 = vpop.f32.mrb[11].mxu0 }
 0x2f8   :  { %v670_v8 = vadd.f32 %v956_v5, %v910_v3  ;;  %v959_v9 = vadd.f32 %v958_v7, %v957_v6 }
 0x2fa   :  { %v673_v10 = vadd.f32 %v959_v9, %v910_v3  ;;  %v684_v11 = vmax.f32 %v670_v8, 0.0 }
 0x2fc   :  { %v685_v12 = vmax.f32 %v673_v10, 0.0  ;;  %v960_v13 = vpop.f32.mrb[12].mxu0 }
 0x2fd   :  { %v961_v14 = vpop.f32.mrb[13].mxu0 }
 0x2fe   :  { %v962_v15 = vadd.f32 %v961_v14, %v960_v13  ;;  %v963_v16 = vpop.f32.mrb[14].mxu0  ;;  %v688_v17 = vpack.c.bf16 %v685_v12, %v684_v11 }
 0x2ff   :  { %v964_v18 = vpop.f32.mrb[15].mxu0 }
 0x300   :  { %v678_v19 = vadd.f32 %v962_v15, %v910_v3  ;;  %v965_v20 = vadd.f32 %v964_v18, %v963_v16  ;;  %992 = vmatprep.mubr.bf16.mxu0 %v688_v17 }
 0x302   :  { %v681_v21 = vadd.f32 %v965_v20, %v910_v3  ;;  %v686_v22 = vmax.f32 %v678_v19, 0.0 }
 0x304   :  { %v687_v23 = vmax.f32 %v681_v21, 0.0 }
 0x306   :  { %v689_v24 = vpack.c.bf16 %v687_v23, %v686_v22 }
 0x308   :  { %993 = vmatmul.mubr.bf16.vlgmr.msra.gmra.mrb[16].mxu0 %v689_v24 }
 0x3db   :  { %v994_v26 = vpop.f32.mrb[16].mxu0 }
 0x3dc   :  { %v804_v27 = vadd.f32 %v994_v26, %v927_v25  ;;  %v795_v28 = vpop.f32.mrb[17].mxu0 }
 0x3dd   :  { %v796_v29 = vadd.f32 %v927_v25, %v795_v28  ;;  %v995_v30 = vpop.f32.mrb[18].mxu0 }
 0x3de   :  { %v812_v31 = vmul.f32 0.5, %v804_v27  ;;  %v807_v32 = vadd.f32 %v995_v30, %v927_v25  ;;  %v798_v33 = vpop.f32.mrb[19].mxu0 }
 0x3df   :  { %v810_v34 = vmul.f32 0.5, %v796_v29  ;;  %v799_v35 = vadd.f32 %v927_v25, %v798_v33 }
 0x3e0   :  { %1086 = vtanh.f32 %v812_v31  ;;  %v813_v36 = vmul.f32 0.5, %v807_v32 }
 0x3e1   :  { %1088 = vtanh.f32 %v810_v34  ;;  %v811_v37 = vmul.f32 0.5, %v799_v35 }
 0x3e2   :  { %1090 = vtanh.f32 %v813_v36 }
 0x3e3   :  { %1092 = vtanh.f32 %v811_v37 }
 0x3ea   :  { %v1087_v38 = vpop.eup %1086 }
 0x3eb   :  { %v1089_v39 = vpop.eup %1088  ;;  %v820_v40 = vmul.f32 0.5, %v1087_v38 }
 0x3ec   :  { %v1091_v41 = vpop.eup %1090  ;;  %v818_v42 = vmul.f32 0.5, %v1089_v39 }
 0x3ed   :  { %v1093_v43 = vpop.eup %1092  ;;  %v821_v44 = vmul.f32 0.5, %v1091_v41  ;;  %v824_v45 = vadd.f32 0.5, %v820_v40 }
 0x3ee   :  { %v819_v46 = vmul.f32 0.5, %v1093_v43  ;;  %v822_v47 = vadd.f32 0.5, %v818_v42 }
 0x3ef   :  { %v825_v48 = vadd.f32 0.5, %v821_v44 }
 0x3f0   :  { %v823_v49 = vadd.f32 0.5, %v819_v46  ;;  %v826_v50 = vsub.f32 %v822_v47, %v824_v45 }
 0x3f2   :  { %v828_v52 = vand.u32 2147483647, %v826_v50  ;;  %v827_v53 = vsub.f32 %v823_v49, %v825_v48 }
 0x3f4   :  { %v837_v54 = vmul.f32 %v936_v51, %v828_v52  ;;  %v829_v55 = vand.u32 2147483647, %v827_v53 }
 0x3f6   :  { %839 = vadd.xlane.f32.xlu0 %v837_v54  ;;  %v838_v56 = vmul.f32 %v936_v51, %v829_v55 }
 0x3fa   :  { %841 = vadd.xlane.f32.xlu0 %v838_v56 }
 0x483   :  { %v840_v58 = vpop.xlane.xlu0 %839 }
 0x484   :  { %v850_v59 = vadd.f32 %v937_v57, %v840_v58 }
 0x486   :  { %v852_v60 = vmul.f32 0.5, %v850_v59 }
 0x487   :  { %v842_v61 = vpop.xlane.xlu0 %841 }
 0x488   :  { %1094 = vtanh.f32 %v852_v60  ;;  %v851_v62 = vadd.f32 %v937_v57, %v842_v61 }
 0x48a   :  { %v853_v63 = vmul.f32 0.5, %v851_v62 }
 0x48c   :  { %1096 = vtanh.f32 %v853_v63 }
 0x492   :  { %v1095_v0 = vpop.eup %1094 }
 0x493   :  { %v856_v1 = vmul.f32 0.5, %v1095_v0 }
 0x495   :  { %v858_v2 = vadd.f32 0.5, %v856_v1 }
 0x496   :  { %v1097_v3 = vpop.eup %1096 }
 0x497   :  { %861 = vst.msk [vmem:[%s1396_s11] sm:$0xff] %vm860_vm1, %v858_v2  ;;  %v857_v4 = vmul.f32 0.5, %v1097_v3 }
 0x499   :  { %v859_v5 = vadd.f32 0.5, %v857_v4 }
 0x49b   :  { %862 = vst.msk [vmem:[%s1396_s11 + $0x8] sm:$0xff] %vm860_vm1, %v859_v5 }
 0x49c   :  { %867 = vsyncpa [#allocation4], 1 }
 0x49d   :  { %868 = vsyncpa [#allocation6], 1 }
 0x49e   :  { %869 = vsyncpa [#allocation9], 1 }

</bundles_post_ra>
